<compile_context>
chip_gen: v6e
topology: v6e:2x2x1
jax: 0.10.0
libtpu: 0.0.40
codegen_flags: <defaults>
</compile_context>

<pallas_src>
import functools

import jax
import jax.numpy as jnp
from jax.experimental import pallas as pl
from jax.experimental.pallas import tpu as pltpu


def _basic_block_kernel(x_ref, m_ref, w1_ref, s1_ref, w2_ref, s2_ref, o_ref,
                        im2col_ref, *, H, W, CP):
  """Single grid step over the whole batch-folded block.

  x_ref:      (CP, L)      L = N*H*W; channels in sublanes, pixels in lanes
  m_ref:      (9*CP, L)    per-tap boundary masks, pre-broadcast to CP rows
  w*_ref:     (CP, 9*CP)   BN-scale-folded conv weights (tap-major columns)
  s*_ref:     (CP, 1)      folded BN shift
  o_ref:      (CP, L)
  im2col_ref: (9*CP, L)    VMEM scratch reused by both convs
  """
  L = x_ref.shape[1]
  x = x_ref[...]                                      # (CP, L) f32

  def conv3x3_bn(inp, w_ref, s_ref):
    # Build the (9*CP, L) im2col matrix directly in VMEM scratch: one lane
    # rotation (XLU) + one pre-broadcast mask multiply (VPU) per tap, stored
    # as full 8-sublane-aligned tiles.  Then a single MXU matmul.
    for tap in range(9):
      dy, dx = tap // 3 - 1, tap % 3 - 1
      delta = dy * W + dx
      rows = pl.ds(tap * CP, CP)                      # static, 8-aligned
      if delta == 0:
        im2col_ref[rows, :] = inp
      else:
        shifted = pltpu.roll(inp, shift=(-delta) % L, axis=1)
        im2col_ref[rows, :] = shifted * m_ref[rows, :]
    y = jnp.dot(w_ref[...], im2col_ref[...],
                preferred_element_type=jnp.float32)   # (CP, L)
    return y + s_ref[...]                             # BN shift (lane bcast)

  out1 = jnp.maximum(conv3x3_bn(x, w1_ref, s1_ref), 0.0)   # conv1->bn1->relu
  out2 = conv3x3_bn(out1, w2_ref, s2_ref) + x              # conv2->bn2->+id_x
  o_ref[...] = jnp.maximum(out2, 0.0)                      # relu


def basic_block_curve_pallas(x_nchw, w1_oihw, scale1, shift1,
                             w2_oihw, scale2, shift2):
  """x_nchw: (N, C, H, W) f32.  w*_oihw: (C, C, 3, 3) curve-blended conv
  weights (OIHW).  scale/shift: (C,) folded eval-mode BN affine params.
  Returns (N, C, H, W) f32."""
  N, C, H, W = x_nchw.shape
  assert w1_oihw.shape == (C, C, 3, 3)   # downsample is None => stride 1,
  assert w2_oihw.shape == (C, C, 3, 3)   # inplanes == planes
  CP = max(8, -(-C // 8) * 8)            # pad channels to 8-sublane multiple
  L = N * H * W
  assert L % 128 == 0, "TODO(synk): pad flattened N*H*W to a 128 multiple"

  # Fold the batch into the lane axis: (N,C,H,W) -> (C, N*H*W); zero-pad C.
  x = jnp.transpose(x_nchw, (1, 0, 2, 3)).reshape(C, L).astype(jnp.float32)
  x = jnp.pad(x, ((0, CP - C), (0, 0)))

  # Per-tap boundary masks over the concatenated lane axis, pre-broadcast to
  # CP sublanes (built once here; zero in-kernel broadcasts).  Within-image
  # validity also prevents rolls from reading across image boundaries.
  idx = jnp.arange(L, dtype=jnp.int32)
  row = (idx // W) % H
  col = idx % W
  mask_rows = []
  for tap in range(9):
    dy, dx = tap // 3 - 1, tap % 3 - 1
    valid = ((row + dy >= 0) & (row + dy < H) &
             (col + dx >= 0) & (col + dx < W)).astype(jnp.float32)
    mask_rows.append(jnp.broadcast_to(valid[None, :], (CP, L)))
  mask = jnp.concatenate(mask_rows, axis=0)            # (9*CP, L)

  def fold(w_oihw, scale):
    # (Cout,Cin,3,3) -> zero-pad channels -> (CP, 9*CP) tap-major columns,
    # eval-mode BN scale folded into the weights.
    w = jnp.pad(w_oihw, ((0, CP - C), (0, CP - C), (0, 0), (0, 0)))
    wmat = jnp.transpose(w, (0, 2, 3, 1)).reshape(CP, 9 * CP)
    s = jnp.pad(scale, (0, CP - C))
    return (wmat * s[:, None]).astype(jnp.float32)

  w1 = fold(w1_oihw, scale1)                           # (CP, 9*CP)
  w2 = fold(w2_oihw, scale2)
  s1 = jnp.pad(shift1, (0, CP - C)).reshape(CP, 1).astype(jnp.float32)
  s2 = jnp.pad(shift2, (0, CP - C)).reshape(CP, 1).astype(jnp.float32)

  kernel = functools.partial(_basic_block_kernel, H=H, W=W, CP=CP)
  out = pl.pallas_call(
      kernel,
      out_shape=jax.ShapeDtypeStruct((CP, L), jnp.float32),
      grid_spec=pltpu.PrefetchScalarGridSpec(
          num_scalar_prefetch=0,
          grid=(1,),
          in_specs=[
              pl.BlockSpec((CP, L), lambda n: (0, 0)),        # x
              pl.BlockSpec((9 * CP, L), lambda n: (0, 0)),    # boundary masks
              pl.BlockSpec((CP, 9 * CP), lambda n: (0, 0)),   # w1 (bn1 scale)
              pl.BlockSpec((CP, 1), lambda n: (0, 0)),        # bn1 shift
              pl.BlockSpec((CP, 9 * CP), lambda n: (0, 0)),   # w2 (bn2 scale)
              pl.BlockSpec((CP, 1), lambda n: (0, 0)),        # bn2 shift
          ],
          out_specs=pl.BlockSpec((CP, L), lambda n: (0, 0)),
          scratch_shapes=[pltpu.VMEM((9 * CP, L), jnp.float32)],
      ),
      compiler_params=pltpu.CompilerParams(
          dimension_semantics=("arbitrary",)),
  )(x, mask, w1, s1, w2, s2)

  out = out[:C].reshape(C, N, H, W)                    # drop channel padding
  return jnp.transpose(out, (1, 0, 2, 3))              # back to NCHW


def _ref_forward(x_nchw, w1_oihw, scale1, shift1, w2_oihw, scale2, shift2):
  """Pure-JAX reference (XLA conv) for correctness checking."""
  conv = functools.partial(
      jax.lax.conv_general_dilated,
      window_strides=(1, 1), padding='SAME',
      dimension_numbers=('NCHW', 'OIHW', 'NCHW'))
  bn = lambda y, s, b: y * s[None, :, None, None] + b[None, :, None, None]
  o = jax.nn.relu(bn(conv(x_nchw, w1_oihw), scale1, shift1))
  o = bn(conv(o, w2_oihw), scale2, shift2)
  return jax.nn.relu(o + x_nchw)


if __name__ == "__main__":
  key = jax.random.PRNGKey(0)
  N, C, H, W = 2, 4, 16, 16            # inplanes == planes == 4, stride == 1
  num_bends = 3                        # len(fix_points)
  eps = 1e-5

  ks = jax.random.split(key, 8)
  x = jax.random.normal(ks[0], (N, C, H, W), jnp.float32)

  # Curve parameters: one tensor per bend, blended with Bezier coeffs at t=0.3.
  t = 0.3
  coeffs_t = jnp.array([(1 - t) ** 2, 2 * t * (1 - t), t ** 2], jnp.float32)

  w1_bends = 0.3 * jax.random.normal(ks[1], (num_bends, C, C, 3, 3), jnp.float32)
  w2_bends = 0.3 * jax.random.normal(ks[2], (num_bends, C, C, 3, 3), jnp.float32)
  g1_bends = 1.0 + 0.1 * jax.random.normal(ks[3], (num_bends, C), jnp.float32)
  b1_bends = 0.1 * jax.random.normal(ks[4], (num_bends, C), jnp.float32)
  g2_bends = 1.0 + 0.1 * jax.random.normal(ks[5], (num_bends, C), jnp.float32)
  b2_bends = 0.1 * jax.random.normal(ks[6], (num_bends, C), jnp.float32)
  run_mean1 = jnp.zeros((C,), jnp.float32)   # BN running stats (shared buffers)
  run_var1 = jnp.ones((C,), jnp.float32)
  run_mean2 = jnp.zeros((C,), jnp.float32)
  run_var2 = jnp.ones((C,), jnp.float32)

  # Curve-blend parameters (glue): param(t) = sum_k coeffs_t[k] * param_k
  blend = lambda p: jnp.einsum('k,k...->...', coeffs_t, p)
  w1_oihw = blend(w1_bends)                  # (Cout, Cin, 3, 3)
  w2_oihw = blend(w2_bends)
  g1, b1 = blend(g1_bends), blend(b1_bends)
  g2, b2 = blend(g2_bends), blend(b2_bends)

  # Fold BN (inference mode) into per-channel scale/shift.
  scale1 = g1 / jnp.sqrt(run_var1 + eps)
  shift1 = b1 - run_mean1 * scale1
  scale2 = g2 / jnp.sqrt(run_var2 + eps)
  shift2 = b2 - run_mean2 * scale2

  out = basic_block_curve_pallas(x, w1_oihw, scale1, shift1,
                                 w2_oihw, scale2, shift2)
  out = jax.block_until_ready(out)

  ref = _ref_forward(x, w1_oihw, scale1, shift1, w2_oihw, scale2, shift2)
  assert out.shape == (N, C, H, W)
  assert jnp.allclose(out, ref, atol=1e-3, rtol=1e-3), float(
      jnp.max(jnp.abs(out - ref)))

  print("KERNEL_OK")
</pallas_src>

<mosaic_0001>
module attributes {stable_mosaic.version = 11 : i64} {
  func.func @_basic_block_kernel(%arg0: i32, %arg1: memref<8x512xf32, #tpu.memory_space<vmem>>, %arg2: memref<72x512xf32, #tpu.memory_space<vmem>>, %arg3: memref<8x72xf32, #tpu.memory_space<vmem>>, %arg4: memref<8x1xf32, #tpu.memory_space<vmem>>, %arg5: memref<8x72xf32, #tpu.memory_space<vmem>>, %arg6: memref<8x1xf32, #tpu.memory_space<vmem>>, %arg7: memref<8x512xf32, #tpu.memory_space<vmem>>, %arg8: memref<72x512xf32, #tpu.memory_space<vmem>>) attributes {dimension_semantics = [#tpu.dimension_semantics<arbitrary>], iteration_bounds = array<i64: 1>, scalar_prefetch = 0 : i64, scratch_operands = 1 : i64, tpu.core_type = #tpu.core_type<tc>, window_params = [{pipeline_mode = #tpu.pipeline_mode<synchronous>, transform_indices = @transform_0, window_bounds = array<i64: 8, 512>}, {pipeline_mode = #tpu.pipeline_mode<synchronous>, transform_indices = @transform_1, window_bounds = array<i64: 72, 512>}, {pipeline_mode = #tpu.pipeline_mode<synchronous>, transform_indices = @transform_2, window_bounds = array<i64: 8, 72>}, {pipeline_mode = #tpu.pipeline_mode<synchronous>, transform_indices = @transform_3, window_bounds = array<i64: 8, 1>}, {pipeline_mode = #tpu.pipeline_mode<synchronous>, transform_indices = @transform_4, window_bounds = array<i64: 8, 72>}, {pipeline_mode = #tpu.pipeline_mode<synchronous>, transform_indices = @transform_5, window_bounds = array<i64: 8, 1>}, {pipeline_mode = #tpu.pipeline_mode<synchronous>, transform_indices = @transform_6, window_bounds = array<i64: 8, 512>}]} {
    %c0 = arith.constant 0 : index
    %c0_0 = arith.constant 0 : index
    %0 = vector.load %arg1[%c0, %c0_0] : memref<8x512xf32, #tpu.memory_space<vmem>>, vector<8x512xf32>
    %c17_i32 = arith.constant 17 : i32
    %1 = tpu.dynamic_rotate %0 by %c17_i32 dim 1 : vector<8x512xf32>, i32 -> vector<8x512xf32>
    %c0_1 = arith.constant 0 : index
    %c0_2 = arith.constant 0 : index
    %2 = vector.load %arg2[%c0_1, %c0_2] : memref<72x512xf32, #tpu.memory_space<vmem>>, vector<8x512xf32>
    %3 = arith.mulf %1, %2 : vector<8x512xf32>
    %c0_3 = arith.constant 0 : index
    %c0_4 = arith.constant 0 : index
    %4 = vector.load %arg8[%c0_3, %c0_4] : memref<72x512xf32, #tpu.memory_space<vmem>>, vector<8x512xf32>
    tpu.vector_store %arg8[%c0_3, %c0_4], %3 {strides = array<i32>} : memref<72x512xf32, #tpu.memory_space<vmem>>, vector<8x512xf32>,
    %c16_i32 = arith.constant 16 : i32
    %5 = tpu.dynamic_rotate %0 by %c16_i32 dim 1 : vector<8x512xf32>, i32 -> vector<8x512xf32>
    %c8 = arith.constant 8 : index
    %c0_5 = arith.constant 0 : index
    %6 = vector.load %arg2[%c8, %c0_5] : memref<72x512xf32, #tpu.memory_space<vmem>>, vector<8x512xf32>
    %7 = arith.mulf %5, %6 : vector<8x512xf32>
    %c8_6 = arith.constant 8 : index
    %c0_7 = arith.constant 0 : index
    %8 = vector.load %arg8[%c8_6, %c0_7] : memref<72x512xf32, #tpu.memory_space<vmem>>, vector<8x512xf32>
    tpu.vector_store %arg8[%c8_6, %c0_7], %7 {strides = array<i32>} : memref<72x512xf32, #tpu.memory_space<vmem>>, vector<8x512xf32>,
    %c15_i32 = arith.constant 15 : i32
    %9 = tpu.dynamic_rotate %0 by %c15_i32 dim 1 : vector<8x512xf32>, i32 -> vector<8x512xf32>
    %c16 = arith.constant 16 : index
    %c0_8 = arith.constant 0 : index
    %10 = vector.load %arg2[%c16, %c0_8] : memref<72x512xf32, #tpu.memory_space<vmem>>, vector<8x512xf32>
    %11 = arith.mulf %9, %10 : vector<8x512xf32>
    %c16_9 = arith.constant 16 : index
    %c0_10 = arith.constant 0 : index
    %12 = vector.load %arg8[%c16_9, %c0_10] : memref<72x512xf32, #tpu.memory_space<vmem>>, vector<8x512xf32>
    tpu.vector_store %arg8[%c16_9, %c0_10], %11 {strides = array<i32>} : memref<72x512xf32, #tpu.memory_space<vmem>>, vector<8x512xf32>,
    %c1_i32 = arith.constant 1 : i32
    %13 = tpu.dynamic_rotate %0 by %c1_i32 dim 1 : vector<8x512xf32>, i32 -> vector<8x512xf32>
    %c24 = arith.constant 24 : index
    %c0_11 = arith.constant 0 : index
    %14 = vector.load %arg2[%c24, %c0_11] : memref<72x512xf32, #tpu.memory_space<vmem>>, vector<8x512xf32>
    %15 = arith.mulf %13, %14 : vector<8x512xf32>
    %c24_12 = arith.constant 24 : index
    %c0_13 = arith.constant 0 : index
    %16 = vector.load %arg8[%c24_12, %c0_13] : memref<72x512xf32, #tpu.memory_space<vmem>>, vector<8x512xf32>
    tpu.vector_store %arg8[%c24_12, %c0_13], %15 {strides = array<i32>} : memref<72x512xf32, #tpu.memory_space<vmem>>, vector<8x512xf32>,
    %c32 = arith.constant 32 : index
    %c0_14 = arith.constant 0 : index
    %17 = vector.load %arg8[%c32, %c0_14] : memref<72x512xf32, #tpu.memory_space<vmem>>, vector<8x512xf32>
    tpu.vector_store %arg8[%c32, %c0_14], %0 {strides = array<i32>} : memref<72x512xf32, #tpu.memory_space<vmem>>, vector<8x512xf32>,
    %c511_i32 = arith.constant 511 : i32
    %18 = tpu.dynamic_rotate %0 by %c511_i32 dim 1 : vector<8x512xf32>, i32 -> vector<8x512xf32>
    %c40 = arith.constant 40 : index
    %c0_15 = arith.constant 0 : index
    %19 = vector.load %arg2[%c40, %c0_15] : memref<72x512xf32, #tpu.memory_space<vmem>>, vector<8x512xf32>
    %20 = arith.mulf %18, %19 : vector<8x512xf32>
    %c40_16 = arith.constant 40 : index
    %c0_17 = arith.constant 0 : index
    %21 = vector.load %arg8[%c40_16, %c0_17] : memref<72x512xf32, #tpu.memory_space<vmem>>, vector<8x512xf32>
    tpu.vector_store %arg8[%c40_16, %c0_17], %20 {strides = array<i32>} : memref<72x512xf32, #tpu.memory_space<vmem>>, vector<8x512xf32>,
    %c497_i32 = arith.constant 497 : i32
    %22 = tpu.dynamic_rotate %0 by %c497_i32 dim 1 : vector<8x512xf32>, i32 -> vector<8x512xf32>
    %c48 = arith.constant 48 : index
    %c0_18 = arith.constant 0 : index
    %23 = vector.load %arg2[%c48, %c0_18] : memref<72x512xf32, #tpu.memory_space<vmem>>, vector<8x512xf32>
    %24 = arith.mulf %22, %23 : vector<8x512xf32>
    %c48_19 = arith.constant 48 : index
    %c0_20 = arith.constant 0 : index
    %25 = vector.load %arg8[%c48_19, %c0_20] : memref<72x512xf32, #tpu.memory_space<vmem>>, vector<8x512xf32>
    tpu.vector_store %arg8[%c48_19, %c0_20], %24 {strides = array<i32>} : memref<72x512xf32, #tpu.memory_space<vmem>>, vector<8x512xf32>,
    %c496_i32 = arith.constant 496 : i32
    %26 = tpu.dynamic_rotate %0 by %c496_i32 dim 1 : vector<8x512xf32>, i32 -> vector<8x512xf32>
    %c56 = arith.constant 56 : index
    %c0_21 = arith.constant 0 : index
    %27 = vector.load %arg2[%c56, %c0_21] : memref<72x512xf32, #tpu.memory_space<vmem>>, vector<8x512xf32>
    %28 = arith.mulf %26, %27 : vector<8x512xf32>
    %c56_22 = arith.constant 56 : index
    %c0_23 = arith.constant 0 : index
    %29 = vector.load %arg8[%c56_22, %c0_23] : memref<72x512xf32, #tpu.memory_space<vmem>>, vector<8x512xf32>
    tpu.vector_store %arg8[%c56_22, %c0_23], %28 {strides = array<i32>} : memref<72x512xf32, #tpu.memory_space<vmem>>, vector<8x512xf32>,
    %c495_i32 = arith.constant 495 : i32
    %30 = tpu.dynamic_rotate %0 by %c495_i32 dim 1 : vector<8x512xf32>, i32 -> vector<8x512xf32>
    %c64 = arith.constant 64 : index
    %c0_24 = arith.constant 0 : index
    %31 = vector.load %arg2[%c64, %c0_24] : memref<72x512xf32, #tpu.memory_space<vmem>>, vector<8x512xf32>
    %32 = arith.mulf %30, %31 : vector<8x512xf32>
    %c64_25 = arith.constant 64 : index
    %c0_26 = arith.constant 0 : index
    %33 = vector.load %arg8[%c64_25, %c0_26] : memref<72x512xf32, #tpu.memory_space<vmem>>, vector<8x512xf32>
    tpu.vector_store %arg8[%c64_25, %c0_26], %32 {strides = array<i32>} : memref<72x512xf32, #tpu.memory_space<vmem>>, vector<8x512xf32>,
    %c0_27 = arith.constant 0 : index
    %c0_28 = arith.constant 0 : index
    %34 = vector.load %arg3[%c0_27, %c0_28] : memref<8x72xf32, #tpu.memory_space<vmem>>, vector<8x72xf32>
    %c0_29 = arith.constant 0 : index
    %c0_30 = arith.constant 0 : index
    %35 = vector.load %arg8[%c0_29, %c0_30] : memref<72x512xf32, #tpu.memory_space<vmem>>, vector<72x512xf32>
    %cst = arith.constant dense<0.000000e+00> : vector<8x512xf32>
    %36 = tpu.matmul %34, %35, %cst {dimension_numbers = #tpu.dot_dimension_numbers<[1], [0], [0], [1], [0, 0, 1, 1], [], []>} : vector<8x72xf32>, vector<72x512xf32>, vector<8x512xf32> -> vector<8x512xf32>
    %c0_31 = arith.constant 0 : index
    %c0_32 = arith.constant 0 : index
    %37 = vector.load %arg4[%c0_31, %c0_32] : memref<8x1xf32, #tpu.memory_space<vmem>>, vector<8x1xf32>
    %38 = vector.broadcast %37 : vector<8x1xf32> to vector<8x512xf32>
    %39 = arith.addf %36, %38 : vector<8x512xf32>
    %cst_33 = arith.constant 0.000000e+00 : f32
    %40 = vector.broadcast %cst_33 : f32 to vector<8x512xf32>
    %41 = arith.maximumf %39, %40 : vector<8x512xf32>
    %c17_i32_34 = arith.constant 17 : i32
    %42 = tpu.dynamic_rotate %41 by %c17_i32_34 dim 1 : vector<8x512xf32>, i32 -> vector<8x512xf32>
    %c0_35 = arith.constant 0 : index
    %c0_36 = arith.constant 0 : index
    %43 = vector.load %arg2[%c0_35, %c0_36] : memref<72x512xf32, #tpu.memory_space<vmem>>, vector<8x512xf32>
    %44 = arith.mulf %42, %43 : vector<8x512xf32>
    %c0_37 = arith.constant 0 : index
    %c0_38 = arith.constant 0 : index
    %45 = vector.load %arg8[%c0_37, %c0_38] : memref<72x512xf32, #tpu.memory_space<vmem>>, vector<8x512xf32>
    tpu.vector_store %arg8[%c0_37, %c0_38], %44 {strides = array<i32>} : memref<72x512xf32, #tpu.memory_space<vmem>>, vector<8x512xf32>,
    %c16_i32_39 = arith.constant 16 : i32
    %46 = tpu.dynamic_rotate %41 by %c16_i32_39 dim 1 : vector<8x512xf32>, i32 -> vector<8x512xf32>
    %c8_40 = arith.constant 8 : index
    %c0_41 = arith.constant 0 : index
    %47 = vector.load %arg2[%c8_40, %c0_41] : memref<72x512xf32, #tpu.memory_space<vmem>>, vector<8x512xf32>
    %48 = arith.mulf %46, %47 : vector<8x512xf32>
    %c8_42 = arith.constant 8 : index
    %c0_43 = arith.constant 0 : index
    %49 = vector.load %arg8[%c8_42, %c0_43] : memref<72x512xf32, #tpu.memory_space<vmem>>, vector<8x512xf32>
    tpu.vector_store %arg8[%c8_42, %c0_43], %48 {strides = array<i32>} : memref<72x512xf32, #tpu.memory_space<vmem>>, vector<8x512xf32>,
    %c15_i32_44 = arith.constant 15 : i32
    %50 = tpu.dynamic_rotate %41 by %c15_i32_44 dim 1 : vector<8x512xf32>, i32 -> vector<8x512xf32>
    %c16_45 = arith.constant 16 : index
    %c0_46 = arith.constant 0 : index
    %51 = vector.load %arg2[%c16_45, %c0_46] : memref<72x512xf32, #tpu.memory_space<vmem>>, vector<8x512xf32>
    %52 = arith.mulf %50, %51 : vector<8x512xf32>
    %c16_47 = arith.constant 16 : index
    %c0_48 = arith.constant 0 : index
    %53 = vector.load %arg8[%c16_47, %c0_48] : memref<72x512xf32, #tpu.memory_space<vmem>>, vector<8x512xf32>
    tpu.vector_store %arg8[%c16_47, %c0_48], %52 {strides = array<i32>} : memref<72x512xf32, #tpu.memory_space<vmem>>, vector<8x512xf32>,
    %c1_i32_49 = arith.constant 1 : i32
    %54 = tpu.dynamic_rotate %41 by %c1_i32_49 dim 1 : vector<8x512xf32>, i32 -> vector<8x512xf32>
    %c24_50 = arith.constant 24 : index
    %c0_51 = arith.constant 0 : index
    %55 = vector.load %arg2[%c24_50, %c0_51] : memref<72x512xf32, #tpu.memory_space<vmem>>, vector<8x512xf32>
    %56 = arith.mulf %54, %55 : vector<8x512xf32>
    %c24_52 = arith.constant 24 : index
    %c0_53 = arith.constant 0 : index
    %57 = vector.load %arg8[%c24_52, %c0_53] : memref<72x512xf32, #tpu.memory_space<vmem>>, vector<8x512xf32>
    tpu.vector_store %arg8[%c24_52, %c0_53], %56 {strides = array<i32>} : memref<72x512xf32, #tpu.memory_space<vmem>>, vector<8x512xf32>,
    %c32_54 = arith.constant 32 : index
    %c0_55 = arith.constant 0 : index
    %58 = vector.load %arg8[%c32_54, %c0_55] : memref<72x512xf32, #tpu.memory_space<vmem>>, vector<8x512xf32>
    tpu.vector_store %arg8[%c32_54, %c0_55], %41 {strides = array<i32>} : memref<72x512xf32, #tpu.memory_space<vmem>>, vector<8x512xf32>,
    %c511_i32_56 = arith.constant 511 : i32
    %59 = tpu.dynamic_rotate %41 by %c511_i32_56 dim 1 : vector<8x512xf32>, i32 -> vector<8x512xf32>
    %c40_57 = arith.constant 40 : index
    %c0_58 = arith.constant 0 : index
    %60 = vector.load %arg2[%c40_57, %c0_58] : memref<72x512xf32, #tpu.memory_space<vmem>>, vector<8x512xf32>
    %61 = arith.mulf %59, %60 : vector<8x512xf32>
    %c40_59 = arith.constant 40 : index
    %c0_60 = arith.constant 0 : index
    %62 = vector.load %arg8[%c40_59, %c0_60] : memref<72x512xf32, #tpu.memory_space<vmem>>, vector<8x512xf32>
    tpu.vector_store %arg8[%c40_59, %c0_60], %61 {strides = array<i32>} : memref<72x512xf32, #tpu.memory_space<vmem>>, vector<8x512xf32>,
    %c497_i32_61 = arith.constant 497 : i32
    %63 = tpu.dynamic_rotate %41 by %c497_i32_61 dim 1 : vector<8x512xf32>, i32 -> vector<8x512xf32>
    %c48_62 = arith.constant 48 : index
    %c0_63 = arith.constant 0 : index
    %64 = vector.load %arg2[%c48_62, %c0_63] : memref<72x512xf32, #tpu.memory_space<vmem>>, vector<8x512xf32>
    %65 = arith.mulf %63, %64 : vector<8x512xf32>
    %c48_64 = arith.constant 48 : index
    %c0_65 = arith.constant 0 : index
    %66 = vector.load %arg8[%c48_64, %c0_65] : memref<72x512xf32, #tpu.memory_space<vmem>>, vector<8x512xf32>
    tpu.vector_store %arg8[%c48_64, %c0_65], %65 {strides = array<i32>} : memref<72x512xf32, #tpu.memory_space<vmem>>, vector<8x512xf32>,
    %c496_i32_66 = arith.constant 496 : i32
    %67 = tpu.dynamic_rotate %41 by %c496_i32_66 dim 1 : vector<8x512xf32>, i32 -> vector<8x512xf32>
    %c56_67 = arith.constant 56 : index
    %c0_68 = arith.constant 0 : index
    %68 = vector.load %arg2[%c56_67, %c0_68] : memref<72x512xf32, #tpu.memory_space<vmem>>, vector<8x512xf32>
    %69 = arith.mulf %67, %68 : vector<8x512xf32>
    %c56_69 = arith.constant 56 : index
    %c0_70 = arith.constant 0 : index
    %70 = vector.load %arg8[%c56_69, %c0_70] : memref<72x512xf32, #tpu.memory_space<vmem>>, vector<8x512xf32>
    tpu.vector_store %arg8[%c56_69, %c0_70], %69 {strides = array<i32>} : memref<72x512xf32, #tpu.memory_space<vmem>>, vector<8x512xf32>,
    %c495_i32_71 = arith.constant 495 : i32
    %71 = tpu.dynamic_rotate %41 by %c495_i32_71 dim 1 : vector<8x512xf32>, i32 -> vector<8x512xf32>
    %c64_72 = arith.constant 64 : index
    %c0_73 = arith.constant 0 : index
    %72 = vector.load %arg2[%c64_72, %c0_73] : memref<72x512xf32, #tpu.memory_space<vmem>>, vector<8x512xf32>
    %73 = arith.mulf %71, %72 : vector<8x512xf32>
    %c64_74 = arith.constant 64 : index
    %c0_75 = arith.constant 0 : index
    %74 = vector.load %arg8[%c64_74, %c0_75] : memref<72x512xf32, #tpu.memory_space<vmem>>, vector<8x512xf32>
    tpu.vector_store %arg8[%c64_74, %c0_75], %73 {strides = array<i32>} : memref<72x512xf32, #tpu.memory_space<vmem>>, vector<8x512xf32>,
    %c0_76 = arith.constant 0 : index
    %c0_77 = arith.constant 0 : index
    %75 = vector.load %arg5[%c0_76, %c0_77] : memref<8x72xf32, #tpu.memory_space<vmem>>, vector<8x72xf32>
    %c0_78 = arith.constant 0 : index
    %c0_79 = arith.constant 0 : index
    %76 = vector.load %arg8[%c0_78, %c0_79] : memref<72x512xf32, #tpu.memory_space<vmem>>, vector<72x512xf32>
    %cst_80 = arith.constant dense<0.000000e+00> : vector<8x512xf32>
    %77 = tpu.matmul %75, %76, %cst_80 {dimension_numbers = #tpu.dot_dimension_numbers<[1], [0], [0], [1], [0, 0, 1, 1], [], []>} : vector<8x72xf32>, vector<72x512xf32>, vector<8x512xf32> -> vector<8x512xf32>
    %c0_81 = arith.constant 0 : index
    %c0_82 = arith.constant 0 : index
    %78 = vector.load %arg6[%c0_81, %c0_82] : memref<8x1xf32, #tpu.memory_space<vmem>>, vector<8x1xf32>
    %79 = vector.broadcast %78 : vector<8x1xf32> to vector<8x512xf32>
    %80 = arith.addf %77, %79 : vector<8x512xf32>
    %81 = arith.addf %80, %0 : vector<8x512xf32>
    %cst_83 = arith.constant 0.000000e+00 : f32
    %82 = vector.broadcast %cst_83 : f32 to vector<8x512xf32>
    %83 = arith.maximumf %81, %82 : vector<8x512xf32>
    %c0_84 = arith.constant 0 : index
    %c0_85 = arith.constant 0 : index
    %84 = vector.load %arg7[%c0_84, %c0_85] : memref<8x512xf32, #tpu.memory_space<vmem>>, vector<8x512xf32>
    tpu.vector_store %arg7[%c0_84, %c0_85], %83 {strides = array<i32>} : memref<8x512xf32, #tpu.memory_space<vmem>>, vector<8x512xf32>,
    return
  }
  func.func @transform_0(%arg0: i32) -> (i32, i32) {
    %c0_i32 = arith.constant 0 : i32
    %c0_i32_0 = arith.constant 0 : i32
    %c0_i32_1 = arith.constant 0 : i32
    return %c0_i32, %c0_i32_0 : i32, i32
  }
  func.func @transform_1(%arg0: i32) -> (i32, i32) {
    %c0_i32 = arith.constant 0 : i32
    %c0_i32_0 = arith.constant 0 : i32
    %c0_i32_1 = arith.constant 0 : i32
    return %c0_i32, %c0_i32_0 : i32, i32
  }
  func.func @transform_2(%arg0: i32) -> (i32, i32) {
    %c0_i32 = arith.constant 0 : i32
    %c0_i32_0 = arith.constant 0 : i32
    %c0_i32_1 = arith.constant 0 : i32
    return %c0_i32, %c0_i32_0 : i32, i32
  }
  func.func @transform_3(%arg0: i32) -> (i32, i32) {
    %c0_i32 = arith.constant 0 : i32
    %c0_i32_0 = arith.constant 0 : i32
    %c0_i32_1 = arith.constant 0 : i32
    return %c0_i32, %c0_i32_0 : i32, i32
  }
  func.func @transform_4(%arg0: i32) -> (i32, i32) {
    %c0_i32 = arith.constant 0 : i32
    %c0_i32_0 = arith.constant 0 : i32
    %c0_i32_1 = arith.constant 0 : i32
    return %c0_i32, %c0_i32_0 : i32, i32
  }
  func.func @transform_5(%arg0: i32) -> (i32, i32) {
    %c0_i32 = arith.constant 0 : i32
    %c0_i32_0 = arith.constant 0 : i32
    %c0_i32_1 = arith.constant 0 : i32
    return %c0_i32, %c0_i32_0 : i32, i32
  }
  func.func @transform_6(%arg0: i32) -> (i32, i32) {
    %c0_i32 = arith.constant 0 : i32
    %c0_i32_0 = arith.constant 0 : i32
    %c0_i32_1 = arith.constant 0 : i32
    return %c0_i32, %c0_i32_0 : i32, i32
  }
}

</mosaic_0001>

<bundles_post_ra>
// kernel: tpu_custom_call.1
= control target key start
LH: loop header
LB: loop body
LE: loop exit
PB: predicated region body
PF: predicated region fallthrough
CT: control target
= control target key end

     0   :  { %11 = vsyncpa [#allocation4], 0  ;;  %s1452_s0 = inlined_call_operand.hbm [shape: f32[8,512], index: 0, kind: input, shape index: {}]   ;;  %s1453_s1 = inlined_call_operand.hbm [shape: f32[72,512], index: 1, kind: input, shape index: {}]   ;;  %s1454_s2 = inlined_call_operand.vmem [shape: f32[8,72], index: 2, kind: input, shape index: {}]   ;;  %s1455_s3 = inlined_call_operand.vmem [shape: f32[8,1], index: 3, kind: input, shape index: {}]   ;;  %s1456_s4 = inlined_call_operand.vmem [shape: f32[8,72], index: 4, kind: input, shape index: {}]   ;;  %s1457_s5 = inlined_call_operand.vmem [shape: f32[8,1], index: 5, kind: input, shape index: {}]   ;;  %s1458_s6 = inlined_call_operand.hbm [shape: f32[8,512], index: 6, kind: output, shape index: {}]  }
   0x1   :  { %12 = vsyncpa [#allocation7], 0 }
   0x2   :  { %13 = vsyncpa [#allocation5], 0  ;;  %s951_s21 = smov [#allocation3]   ;;  %s952_s23 = smov [#allocation6]  }
   0x3   :  { %s20_s22 = sshll.u32 %s951_s21, 4  ;;  %s29_s24 = sshll.u32 %s952_s23, 4  ;;  %s21_s22 = int_to_ptr.vmem [resolvable:$true] %s20_s22  ;;  %s30_s24 = int_to_ptr.vmem [resolvable:$true] %s29_s24 }
   0x4   :  { %s893_s25 = scalar_lea.vmem %s21_s22, 512  ;;  %p898_p1 = scmp.lt.s32.totalorder %s21_s22, %s21_s22 }
   0x5   :  { %p894_p0 = scmp.ne.s32.totalorder %s21_s22, %s893_s25  ;;  %p899_p2 = scmp.lt.s32.totalorder %s893_s25, %s893_s25 }
   0x7   :  { %p900_p3 = por %p899_p2, %p898_p1 }
   0x9   :  { %p901_p4 = pnand %p900_p3, %p894_p0 }
   0xb   :  { %904 = shalt.err (!%p901_p4)
}
   0xc   :  { %23 = dma.hbm_to_vmem [thread:$0]  %s1452_s0, 512, %s21_s22, [#allocation4]  }
   0xd   :  { %s913_s28 = scalar_lea.vmem %s30_s24, 4608  ;;  %p918_p6 = scmp.lt.s32.totalorder %s30_s24, %s30_s24 }
   0xe   :  { %p914_p5 = scmp.ne.s32.totalorder %s30_s24, %s913_s28  ;;  %p919_p7 = scmp.lt.s32.totalorder %s913_s28, %s913_s28 }
  0x10   :  { %p920_p8 = por %p919_p7, %p918_p6 }
  0x12   :  { %p921_p9 = pnand %p920_p8, %p914_p5 }
  0x14   :  { %924 = shalt.err (!%p921_p9)
}
  0x15   :  { %s953_s29 = smov 512   ;;  %s954_s30 = smov 32  }
  0x16   :  { %35 = dma.hbm_to_vmem [thread:$0]  %s1453_s1, 4608, %s30_s24, [#allocation7], %s953_s29, %s953_s29, %s954_s30  }
  0x17   :  { %945 = dma.done.wait [#allocation4], 512  }
  0x18   :  { %946 = vsyncadd [#allocation4], 4294966784 }
  0x19   :  { %947 = dma.done.wait [#allocation7], 4608  }
  0x1a   :  { %948 = vsyncadd [#allocation7], 4294962688  ;;  %v1007_v0 = vld [vmem:[#allocation3 + $0x10] sm:$0xff]  ;;  %v1009_v1 = vld [vmem:[#allocation3] sm:$0xff]  ;;  %s955_s0 = smov 111   ;;  %s956_s1 = smov 112   ;;  %v62_v7 = vlaneseq }
  0x1b   :  { %239 = vrot.lane.b32.xlu1 %v1007_v0, %s955_s0  ;;  %235 = vrot.lane.b32.xlu0 %v1009_v1, %s955_s0  ;;  %v1015_v2 = vld [vmem:[#allocation3 + $0x18] sm:$0xff]  ;;  %v1017_v3 = vld [vmem:[#allocation3 + $0x8] sm:$0xff]  ;;  %s957_s9 = smov 113   ;;  %s958_s10 = smov 127   ;;  %v962_v4 = vmov 0.0   ;;  %v963_v5 = vmov 0  }
  0x1c   :  { %s959_s11 = smov 1   ;;  %s960_s12 = smov 15   ;;  %371 = vmatprep.mubr.f32.mxu0 %v962_v4  ;;  %442 = vmatprep.mubr.f32.mxu1 %v962_v4  ;;  %v297_v6 = vld [vmem:[%s1455_s3] sm:$0xff]  ;;  %v1084_v8 = vand.u32 127, %v62_v7  ;;  %v1087_v11 = vld [vmem:[#allocation6 + $0x108] sm:$0xff]  ;;  %v1089_v12 = vld [vmem:[#allocation6 + $0x118] sm:$0xff] }
  0x1d   :  { %s961_s13 = smov 16   ;;  %884 = vset.pattern.permute.xlu0 %v963_v5  ;;  %s964_s14 = smov 17   ;;  %v1091_v13 = vld [vmem:[#allocation6 + $0x100] sm:$0xff]  ;;  %v1093_v14 = vld [vmem:[#allocation6 + $0x110] sm:$0xff]  ;;  %v1108_v27 = vld [vmem:[#allocation6 + $0xf8] sm:$0xff]  ;;  %vm303_vm8 = vcmask 588800  }
  0x1e   :  { %vm243_vm0 = vcmp.lt.s32.totalorder %v1084_v8, 111  ;;  %vm218_vm1 = vcmp.lt.s32.totalorder %v1084_v8, 112  ;;  %v1110_v28 = vld [vmem:[#allocation6 + $0xe8] sm:$0xff]  ;;  %v1112_v29 = vld [vmem:[#allocation6 + $0xf0] sm:$0xff]  ;;  %v1114_v30 = vld [vmem:[#allocation6 + $0xe0] sm:$0xff]  ;;  %vm193_vm2 = vcmp.lt.s32.totalorder %v1084_v8, 113 }
  0x1f   :  { %241 = vrot.lane.b32.xlu1 %v1015_v2, %s955_s0  ;;  %237 = vrot.lane.b32.xlu0 %v1017_v3, %s955_s0  ;;  %v1129_v43 = vld [vmem:[#allocation6 + $0xd8] sm:$0xff]  ;;  %v1131_v44 = vld [vmem:[#allocation6 + $0xc8] sm:$0xff]  ;;  %v1133_v45 = vld [vmem:[#allocation6 + $0xd0] sm:$0xff]  ;;  %vm168_vm3 = vcmp.lt.s32.totalorder %v1084_v8, 127  ;;  %vm139_vm4 = vcmp.lt.s32.totalorder %v1084_v8, 1  ;;  %vm114_vm5 = vcmp.lt.s32.totalorder %v1084_v8, 15 }
  0x20   :  { %v1135_v46 = vld [vmem:[#allocation6 + $0xc0] sm:$0xff]  ;;  %v1150_v59 = vld [vmem:[#allocation6 + $0xb8] sm:$0xff]  ;;  %v1152_v60 = vld [vmem:[#allocation6 + $0xa8] sm:$0xff]  ;;  %vm89_vm6 = vcmp.lt.s32.totalorder %v1084_v8, 16  ;;  %vm64_vm7 = vcmp.lt.s32.totalorder %v1084_v8, 17 }
  0x21   :  { %v1154_v61 = vld [vmem:[#allocation6 + $0xb0] sm:$0xff]  ;;  %v1156_v62 = vld [vmem:[#allocation6 + $0xa0] sm:$0xff] }
  0x23   :  { %212 = vrot.lane.b32.xlu1 %v1017_v3, %s956_s1  ;;  %210 = vrot.lane.b32.xlu0 %v1009_v1, %s956_s1 }
  0x27   :  { %216 = vrot.lane.b32.xlu1 %v1015_v2, %s956_s1  ;;  %214 = vrot.lane.b32.xlu0 %v1007_v0, %s956_s1 }
  0x2b   :  { %187 = vrot.lane.b32.xlu1 %v1017_v3, %s957_s9  ;;  %185 = vrot.lane.b32.xlu0 %v1009_v1, %s957_s9 }
  0x2f   :  { %191 = vrot.lane.b32.xlu1 %v1015_v2, %s957_s9  ;;  %189 = vrot.lane.b32.xlu0 %v1007_v0, %s957_s9 }
  0x33   :  { %162 = vrot.lane.b32.xlu1 %v1017_v3, %s958_s10  ;;  %160 = vrot.lane.b32.xlu0 %v1009_v1, %s958_s10 }
  0x37   :  { %166 = vrot.lane.b32.xlu1 %v1015_v2, %s958_s10  ;;  %164 = vrot.lane.b32.xlu0 %v1007_v0, %s958_s10 }
  0x3b   :  { %133 = vrot.lane.b32.xlu1 %v1017_v3, %s959_s11  ;;  %131 = vrot.lane.b32.xlu0 %v1009_v1, %s959_s11 }
  0x3f   :  { %137 = vrot.lane.b32.xlu1 %v1015_v2, %s959_s11  ;;  %135 = vrot.lane.b32.xlu0 %v1007_v0, %s959_s11 }
  0x43   :  { %108 = vrot.lane.b32.xlu1 %v1017_v3, %s960_s12  ;;  %106 = vrot.lane.b32.xlu0 %v1009_v1, %s960_s12 }
  0x47   :  { %112 = vrot.lane.b32.xlu1 %v1015_v2, %s960_s12  ;;  %110 = vrot.lane.b32.xlu0 %v1007_v0, %s960_s12 }
  0x4b   :  { %83 = vrot.lane.b32.xlu1 %v1017_v3, %s961_s13  ;;  %81 = vrot.lane.b32.xlu0 %v1009_v1, %s961_s13 }
  0x4f   :  { %87 = vrot.lane.b32.xlu1 %v1015_v2, %s961_s13  ;;  %85 = vrot.lane.b32.xlu0 %v1007_v0, %s961_s13 }
  0x53   :  { %56 = vrot.lane.b32.xlu1 %v1017_v3, %s964_s14  ;;  %54 = vrot.lane.b32.xlu0 %v1009_v1, %s964_s14 }
  0x57   :  { %60 = vrot.lane.b32.xlu1 %v1015_v2, %s964_s14  ;;  %58 = vrot.lane.b32.xlu0 %v1007_v0, %s964_s14 }
  0x5b   :  { %300 = vperm.xlu0 %884, %v297_v6  }
  0x8d   :  { %v240_v9 = vpop.permute.xlu1 %239  ;;  %v236_v10 = vpop.permute.xlu0 %235 }
  0x91   :  { %v242_v15 = vpop.permute.xlu1 %241  ;;  %v238_v16 = vpop.permute.xlu0 %237 }
  0x92   :  { %v244_v17 = vsel %vm243_vm0, %v240_v9, %v242_v15  ;;  %v246_v18 = vsel %vm243_vm0, %v236_v10, %v238_v16  ;;  %v245_v19 = vsel %vm243_vm0, %v238_v16, %v240_v9  ;;  %v247_v20 = vsel %vm243_vm0, %v242_v15, %v236_v10 }
  0x93   :  { %v253_v21 = vmul.f32 %v1087_v11, %v245_v19  ;;  %v255_v22 = vmul.f32 %v1089_v12, %v247_v20  ;;  %v252_v23 = vmul.f32 %v1091_v13, %v246_v18  ;;  %v254_v24 = vmul.f32 %v1093_v14, %v244_v17  ;;  %v1171_v19 = vld [vmem:[#allocation6 + $0x68] sm:$0xff] }
  0x95   :  { %v213_v25 = vpop.permute.xlu1 %212  ;;  %321 = vmatprep.subr.mxu0 %v253_v21  ;;  %392 = vmatprep.subr.mxu1 %v255_v22  ;;  %v211_v26 = vpop.permute.xlu0 %210 }
  0x96   :  { %322 = vmatpush1.msra.mxu0 %v252_v23  ;;  %393 = vmatpush1.msra.mxu1 %v254_v24  ;;  %v221_v31 = vsel %vm218_vm1, %v211_v26, %v213_v25  ;;  %v1179_v24 = vld [vmem:[#allocation6 + $0x60] sm:$0xff] }
  0x97   :  { %v227_v40 = vmul.f32 %v1114_v30, %v221_v31 }
  0x99   :  { %v217_v32 = vpop.permute.xlu1 %216  ;;  %v215_v33 = vpop.permute.xlu0 %214 }
  0x9a   :  { %v222_v34 = vsel %vm218_vm1, %v217_v32, %v211_v26  ;;  %v219_v35 = vsel %vm218_vm1, %v215_v33, %v217_v32  ;;  %v220_v36 = vsel %vm218_vm1, %v213_v25, %v215_v33  ;;  %v1181_v25 = vld [vmem:[#allocation6 + $0x70] sm:$0xff]  ;;  %v1183_v26 = vld [vmem:[#allocation6 + $0x78] sm:$0xff] }
  0x9b   :  { %v230_v37 = vmul.f32 %v1108_v27, %v222_v34  ;;  %v228_v38 = vmul.f32 %v1110_v28, %v220_v36  ;;  %v229_v39 = vmul.f32 %v1112_v29, %v219_v35 }
  0x9d   :  { %v188_v41 = vpop.permute.xlu1 %187  ;;  %323 = vmatprep.subr.mxu0 %v228_v38  ;;  %394 = vmatprep.subr.mxu1 %v230_v37  ;;  %v186_v42 = vpop.permute.xlu0 %185 }
  0x9e   :  { %324 = vmatpush1.msra.mxu0 %v227_v40  ;;  %395 = vmatpush1.msra.mxu1 %v229_v39  ;;  %v196_v47 = vsel %vm193_vm2, %v186_v42, %v188_v41  ;;  %v1196_v39 = vld [vmem:[#allocation6 + $0x48] sm:$0xff] }
  0x9f   :  { %v202_v56 = vmul.f32 %v1135_v46, %v196_v47 }
  0xa1   :  { %v192_v48 = vpop.permute.xlu1 %191  ;;  %v190_v49 = vpop.permute.xlu0 %189 }
  0xa2   :  { %v197_v50 = vsel %vm193_vm2, %v192_v48, %v186_v42  ;;  %v194_v51 = vsel %vm193_vm2, %v190_v49, %v192_v48  ;;  %v195_v52 = vsel %vm193_vm2, %v188_v41, %v190_v49  ;;  %v1201_v48 = vld [vmem:[#allocation6 + $0x40] sm:$0xff]  ;;  %v1203_v49 = vld [vmem:[#allocation6 + $0x50] sm:$0xff] }
  0xa3   :  { %v205_v53 = vmul.f32 %v1129_v43, %v197_v50  ;;  %v203_v54 = vmul.f32 %v1131_v44, %v195_v52  ;;  %v204_v55 = vmul.f32 %v1133_v45, %v194_v51  ;;  %v1205_v50 = vld [vmem:[#allocation6 + $0x58] sm:$0xff] }
  0xa5   :  { %v163_v57 = vpop.permute.xlu1 %162  ;;  %325 = vmatprep.subr.mxu0 %v203_v54  ;;  %396 = vmatprep.subr.mxu1 %v205_v53  ;;  %v161_v58 = vpop.permute.xlu0 %160 }
  0xa6   :  { %326 = vmatpush1.msra.mxu0 %v202_v56  ;;  %397 = vmatpush1.msra.mxu1 %v204_v55  ;;  %v171_v63 = vsel %vm168_vm3, %v161_v58, %v163_v57 }
  0xa7   :  { %v177_v18 = vmul.f32 %v1156_v62, %v171_v63  ;;  %v1217_v63 = vld [vmem:[#allocation6 + $0x28] sm:$0xff] }
  0xa9   :  { %v167_v5 = vpop.permute.xlu1 %166  ;;  %v165_v6 = vpop.permute.xlu0 %164 }
  0xaa   :  { %v172_v7 = vsel %vm168_vm3, %v167_v5, %v161_v58  ;;  %v169_v9 = vsel %vm168_vm3, %v165_v6, %v167_v5  ;;  %v170_v10 = vsel %vm168_vm3, %v163_v57, %v165_v6 }
  0xab   :  { %v180_v15 = vmul.f32 %v1150_v59, %v172_v7  ;;  %v178_v16 = vmul.f32 %v1152_v60, %v170_v10  ;;  %v179_v17 = vmul.f32 %v1154_v61, %v169_v9  ;;  %v1222_v10 = vld [vmem:[#allocation6 + $0x20] sm:$0xff] }
  0xad   :  { %v134_v20 = vpop.permute.xlu1 %133  ;;  %327 = vmatprep.subr.mxu0 %v178_v16  ;;  %398 = vmatprep.subr.mxu1 %v180_v15  ;;  %v132_v21 = vpop.permute.xlu0 %131  ;;  %v1224_v15 = vld [vmem:[#allocation6 + $0x30] sm:$0xff]  ;;  %v1226_v16 = vld [vmem:[#allocation6 + $0x38] sm:$0xff] }
  0xae   :  { %v142_v22 = vsel %vm139_vm4, %v132_v21, %v134_v20  ;;  %328 = vmatpush1.msra.mxu0 %v177_v18  ;;  %399 = vmatpush1.msra.mxu1 %v179_v17 }
  0xaf   :  { %v149_v23 = vmul.f32 %v1171_v19, %v142_v22  ;;  %329 = vmatprep.subr.mxu0 %v1017_v3  ;;  %400 = vmatprep.subr.mxu1 %v1015_v2 }
  0xb0   :  { %330 = vmatpush1.msra.mxu0 %v1009_v1  ;;  %401 = vmatpush1.msra.mxu1 %v1007_v0 }
  0xb1   :  { %v138_v31 = vpop.permute.xlu1 %137  ;;  %331 = vmatprep.subr.mxu0 %v149_v23  ;;  %v136_v32 = vpop.permute.xlu0 %135 }
  0xb2   :  { %v143_v33 = vsel %vm139_vm4, %v138_v31, %v132_v21  ;;  %v140_v34 = vsel %vm139_vm4, %v136_v32, %v138_v31  ;;  %v141_v35 = vsel %vm139_vm4, %v134_v20, %v136_v32 }
  0xb3   :  { %v148_v36 = vmul.f32 %v1179_v24, %v143_v33  ;;  %v150_v37 = vmul.f32 %v1181_v25, %v141_v35  ;;  %v151_v38 = vmul.f32 %v1183_v26, %v140_v34  ;;  %v1238_v33 = vld [vmem:[#allocation6 + $0x8] sm:$0xff] }
  0xb5   :  { %v109_v40 = vpop.permute.xlu1 %108  ;;  %332 = vmatpush1.msra.mxu0 %v148_v36  ;;  %402 = vmatprep.subr.mxu1 %v151_v38  ;;  %v107_v41 = vpop.permute.xlu0 %106  ;;  %v1243_v38 = vld [vmem:[#allocation6] sm:$0xff] }
  0xb6   :  { %v117_v42 = vsel %vm114_vm5, %v107_v41, %v109_v40  ;;  %403 = vmatpush1.msra.mxu1 %v150_v37 }
  0xb7   :  { %v124_v47 = vmul.f32 %v1196_v39, %v117_v42 }
  0xb9   :  { %v113_v51 = vpop.permute.xlu1 %112  ;;  %333 = vmatprep.subr.mxu0 %v124_v47  ;;  %v111_v52 = vpop.permute.xlu0 %110 }
  0xba   :  { %v118_v53 = vsel %vm114_vm5, %v113_v51, %v107_v41  ;;  %v115_v54 = vsel %vm114_vm5, %v111_v52, %v113_v51  ;;  %v116_v55 = vsel %vm114_vm5, %v109_v40, %v111_v52  ;;  %v1245_v40 = vld [vmem:[#allocation6 + $0x10] sm:$0xff]  ;;  %v1247_v41 = vld [vmem:[#allocation6 + $0x18] sm:$0xff] }
  0xbb   :  { %v123_v56 = vmul.f32 %v1201_v48, %v118_v53  ;;  %v125_v57 = vmul.f32 %v1203_v49, %v116_v55  ;;  %v126_v58 = vmul.f32 %v1205_v50, %v115_v54 }
  0xbd   :  { %v84_v5 = vpop.permute.xlu1 %83  ;;  %334 = vmatpush1.msra.mxu0 %v123_v56  ;;  %404 = vmatprep.subr.mxu1 %v126_v58  ;;  %v82_v6 = vpop.permute.xlu0 %81 }
  0xbe   :  { %v92_v7 = vsel %vm89_vm6, %v82_v6, %v84_v5  ;;  %405 = vmatpush1.msra.mxu1 %v125_v57  ;;  %v260_v57 = vld [vmem:[%s1454_s2] sm:$0xff] }
  0xbf   :  { %v99_v9 = vmul.f32 %v1217_v63, %v92_v7 }
  0xc1   :  { %v88_v17 = vpop.permute.xlu1 %87  ;;  %335 = vmatprep.subr.mxu0 %v99_v9  ;;  %v86_v18 = vpop.permute.xlu0 %85 }
  0xc2   :  { %v93_v20 = vsel %vm89_vm6, %v88_v17, %v82_v6  ;;  %v90_v21 = vsel %vm89_vm6, %v86_v18, %v88_v17  ;;  %v91_v22 = vsel %vm89_vm6, %v84_v5, %v86_v18 }
  0xc3   :  { %v98_v23 = vmul.f32 %v1222_v10, %v93_v20  ;;  %v100_v31 = vmul.f32 %v1224_v15, %v91_v22  ;;  %v101_v32 = vmul.f32 %v1226_v16, %v90_v21 }
  0xc5   :  { %v57_v34 = vpop.permute.xlu1 %56  ;;  %336 = vmatpush1.msra.mxu0 %v98_v23  ;;  %406 = vmatprep.subr.mxu1 %v101_v32  ;;  %v55_v35 = vpop.permute.xlu0 %54  ;;  %v686_v32 = vld [vmem:[%s1457_s5] sm:$0xff] }
  0xc6   :  { %v67_v36 = vsel %vm64_vm7, %v55_v35, %v57_v34  ;;  %407 = vmatpush1.msra.mxu1 %v100_v31 }
  0xc7   :  { %v74_v37 = vmul.f32 %v1238_v33, %v67_v36 }
  0xc9   :  { %v61_v42 = vpop.permute.xlu1 %60  ;;  %337 = vmatprep.subr.mxu0 %v74_v37  ;;  %v59_v47 = vpop.permute.xlu0 %58 }
  0xca   :  { %v68_v51 = vsel %vm64_vm7, %v61_v42, %v55_v35  ;;  %v65_v52 = vsel %vm64_vm7, %v59_v47, %v61_v42  ;;  %v66_v53 = vsel %vm64_vm7, %v57_v34, %v59_v47 }
  0xcb   :  { %v73_v54 = vmul.f32 %v1243_v38, %v68_v51  ;;  %v75_v55 = vmul.f32 %v1245_v40, %v66_v53  ;;  %v76_v56 = vmul.f32 %v1247_v41, %v65_v52 }
  0xcd   :  { %338 = vmatpush1.msra.mxu0 %v73_v54  ;;  %408 = vmatprep.subr.mxu1 %v76_v56 }
  0xce   :  { %865 = vmatmul.mubr.msk.f32.vlgmr.msra.gmra.mxu0 %vm303_vm8, %v260_v57  ;;  %409 = vmatpush1.msra.mxu1 %v75_v55 }
  0xcf   :  { %866 = vmatmul.mubr.msk.f32.vlgmr.msra.gmra.mxu1 %vm303_vm8, %v260_v57  ;;  %759 = vmatprep.mubr.f32.mxu0 %v962_v4 }
  0xd0   :  { %830 = vmatprep.mubr.f32.mxu1 %v962_v4 }
  0xd6   :  { %v301_v58 = vpop.permute.xlu0 %300 }
 0x18e   :  { %v373_v5 = vpop.f32.mrf.mxu0 }
 0x18f   :  { %v374_v6 = vadd.f32 %v373_v5, %v301_v58  ;;  %v444_v7 = vpop.f32.mrf.mxu1 }
 0x190   :  { %v445_v9 = vadd.f32 %v444_v7, %v301_v58  ;;  %v375_v17 = vpop.f32.mrf.mxu0 }
 0x191   :  { %v1265_v18 = vmax.f32 %v374_v6, 0.0  ;;  %v376_v20 = vadd.f32 %v375_v17, %v301_v58  ;;  %v446_v22 = vpop.f32.mrf.mxu1 }
 0x192   :  { %v1267_v21 = vmax.f32 %v445_v9, 0.0  ;;  %v447_v4 = vadd.f32 %v446_v22, %v301_v58 }
 0x193   :  { %625 = vrot.lane.b32.xlu1 %v1265_v18, %s955_s0  ;;  %v1273_v23 = vmax.f32 %v376_v20, 0.0 }
 0x194   :  { %629 = vrot.lane.b32.xlu0 %v1267_v21, %s955_s0  ;;  %v1279_v31 = vmax.f32 %v447_v4, 0.0 }
 0x197   :  { %627 = vrot.lane.b32.xlu1 %v1273_v23, %s955_s0 }
 0x198   :  { %601 = vrot.lane.b32.xlu0 %v1265_v18, %s956_s1 }
 0x19b   :  { %631 = vrot.lane.b32.xlu1 %v1279_v31, %s955_s0 }
 0x19c   :  { %605 = vrot.lane.b32.xlu0 %v1267_v21, %s956_s1 }
 0x19f   :  { %603 = vrot.lane.b32.xlu1 %v1273_v23, %s956_s1 }
 0x1a0   :  { %577 = vrot.lane.b32.xlu0 %v1265_v18, %s957_s9 }
 0x1a3   :  { %607 = vrot.lane.b32.xlu1 %v1279_v31, %s956_s1 }
 0x1a4   :  { %581 = vrot.lane.b32.xlu0 %v1267_v21, %s957_s9 }
 0x1a7   :  { %579 = vrot.lane.b32.xlu1 %v1273_v23, %s957_s9 }
 0x1a8   :  { %553 = vrot.lane.b32.xlu0 %v1265_v18, %s958_s10 }
 0x1ab   :  { %583 = vrot.lane.b32.xlu1 %v1279_v31, %s957_s9 }
 0x1ac   :  { %557 = vrot.lane.b32.xlu0 %v1267_v21, %s958_s10 }
 0x1af   :  { %555 = vrot.lane.b32.xlu1 %v1273_v23, %s958_s10 }
 0x1b0   :  { %525 = vrot.lane.b32.xlu0 %v1265_v18, %s959_s11 }
 0x1b3   :  { %559 = vrot.lane.b32.xlu1 %v1279_v31, %s958_s10 }
 0x1b4   :  { %529 = vrot.lane.b32.xlu0 %v1267_v21, %s959_s11 }
 0x1b7   :  { %527 = vrot.lane.b32.xlu1 %v1273_v23, %s959_s11 }
 0x1b8   :  { %501 = vrot.lane.b32.xlu0 %v1265_v18, %s960_s12 }
 0x1bb   :  { %531 = vrot.lane.b32.xlu1 %v1279_v31, %s959_s11 }
 0x1bc   :  { %505 = vrot.lane.b32.xlu0 %v1267_v21, %s960_s12 }
 0x1bf   :  { %503 = vrot.lane.b32.xlu1 %v1273_v23, %s960_s12 }
 0x1c0   :  { %477 = vrot.lane.b32.xlu0 %v1265_v18, %s961_s13 }
 0x1c3   :  { %507 = vrot.lane.b32.xlu1 %v1279_v31, %s960_s12 }
 0x1c4   :  { %481 = vrot.lane.b32.xlu0 %v1267_v21, %s961_s13 }
 0x1c7   :  { %479 = vrot.lane.b32.xlu1 %v1273_v23, %s961_s13 }
 0x1c8   :  { %453 = vrot.lane.b32.xlu0 %v1265_v18, %s964_s14 }
 0x1cb   :  { %483 = vrot.lane.b32.xlu1 %v1279_v31, %s961_s13 }
 0x1cc   :  { %457 = vrot.lane.b32.xlu0 %v1267_v21, %s964_s14 }
 0x1cf   :  { %455 = vrot.lane.b32.xlu1 %v1273_v23, %s964_s14 }
 0x1d0   :  { %689 = vperm.xlu0 %884, %v686_v32  }
 0x1d3   :  { %459 = vrot.lane.b32.xlu1 %v1279_v31, %s964_s14 }
 0x205   :  { %v626_v34 = vpop.permute.xlu1 %625 }
 0x206   :  { %v630_v35 = vpop.permute.xlu0 %629 }
 0x209   :  { %v628_v36 = vpop.permute.xlu1 %627 }
 0x20a   :  { %v634_v37 = vsel %vm243_vm0, %v628_v36, %v630_v35  ;;  %v635_v42 = vsel %vm243_vm0, %v626_v34, %v628_v36  ;;  %v602_v47 = vpop.permute.xlu0 %601 }
 0x20b   :  { %v641_v51 = vmul.f32 %v635_v42, %v1091_v13  ;;  %v642_v52 = vmul.f32 %v634_v37, %v1087_v11 }
 0x20d   :  { %709 = vmatprep.subr.mxu0 %v642_v52  ;;  %v632_v53 = vpop.permute.xlu1 %631 }
 0x20e   :  { %v633_v54 = vsel %vm243_vm0, %v630_v35, %v632_v53  ;;  %v636_v55 = vsel %vm243_vm0, %v632_v53, %v626_v34  ;;  %v606_v56 = vpop.permute.xlu0 %605  ;;  %710 = vmatpush1.msra.mxu0 %v641_v51 }
 0x20f   :  { %v643_v57 = vmul.f32 %v633_v54, %v1093_v14  ;;  %v644_v58 = vmul.f32 %v636_v55, %v1089_v12 }
 0x211   :  { %780 = vmatprep.subr.mxu1 %v644_v58  ;;  %v604_v5 = vpop.permute.xlu1 %603 }
 0x212   :  { %v610_v13 = vsel %vm218_vm1, %v604_v5, %v606_v56  ;;  %v611_v11 = vsel %vm218_vm1, %v602_v47, %v604_v5  ;;  %v578_v6 = vpop.permute.xlu0 %577  ;;  %781 = vmatpush1.msra.mxu1 %v643_v57 }
 0x213   :  { %v617_v7 = vmul.f32 %v611_v11, %v1114_v30  ;;  %v618_v9 = vmul.f32 %v610_v13, %v1110_v28 }
 0x215   :  { %711 = vmatprep.subr.mxu0 %v618_v9  ;;  %v608_v17 = vpop.permute.xlu1 %607 }
 0x216   :  { %v609_v14 = vsel %vm218_vm1, %v606_v56, %v608_v17  ;;  %v612_v12 = vsel %vm218_vm1, %v608_v17, %v602_v47  ;;  %v582_v20 = vpop.permute.xlu0 %581  ;;  %712 = vmatpush1.msra.mxu0 %v617_v7 }
 0x217   :  { %v619_v22 = vmul.f32 %v609_v14, %v1112_v29  ;;  %v620_v4 = vmul.f32 %v612_v12, %v1108_v27 }
 0x219   :  { %782 = vmatprep.subr.mxu1 %v620_v4  ;;  %v580_v32 = vpop.permute.xlu1 %579 }
 0x21a   :  { %v586_v30 = vsel %vm193_vm2, %v580_v32, %v582_v20  ;;  %v587_v28 = vsel %vm193_vm2, %v578_v6, %v580_v32  ;;  %v554_v34 = vpop.permute.xlu0 %553  ;;  %783 = vmatpush1.msra.mxu1 %v619_v22 }
 0x21b   :  { %v593_v35 = vmul.f32 %v587_v28, %v1135_v46  ;;  %v594_v36 = vmul.f32 %v586_v30, %v1131_v44 }
 0x21d   :  { %713 = vmatprep.subr.mxu0 %v594_v36  ;;  %v584_v37 = vpop.permute.xlu1 %583 }
 0x21e   :  { %v585_v29 = vsel %vm193_vm2, %v582_v20, %v584_v37  ;;  %v588_v27 = vsel %vm193_vm2, %v584_v37, %v578_v6  ;;  %v558_v42 = vpop.permute.xlu0 %557  ;;  %714 = vmatpush1.msra.mxu0 %v593_v35 }
 0x21f   :  { %v595_v47 = vmul.f32 %v585_v29, %v1133_v45  ;;  %v596_v51 = vmul.f32 %v588_v27, %v1129_v43 }
 0x221   :  { %784 = vmatprep.subr.mxu1 %v596_v51  ;;  %v556_v52 = vpop.permute.xlu1 %555 }
 0x222   :  { %v562_v46 = vsel %vm168_vm3, %v556_v52, %v558_v42  ;;  %v563_v44 = vsel %vm168_vm3, %v554_v34, %v556_v52  ;;  %v526_v53 = vpop.permute.xlu0 %525  ;;  %785 = vmatpush1.msra.mxu1 %v595_v47 }
 0x223   :  { %v569_v54 = vmul.f32 %v563_v44, %v1156_v62  ;;  %v570_v55 = vmul.f32 %v562_v46, %v1152_v60 }
 0x225   :  { %715 = vmatprep.subr.mxu0 %v570_v55  ;;  %v560_v56 = vpop.permute.xlu1 %559 }
 0x226   :  { %v561_v45 = vsel %vm168_vm3, %v558_v42, %v560_v56  ;;  %v564_v43 = vsel %vm168_vm3, %v560_v56, %v554_v34  ;;  %v530_v57 = vpop.permute.xlu0 %529  ;;  %716 = vmatpush1.msra.mxu0 %v569_v54 }
 0x227   :  { %v571_v58 = vmul.f32 %v561_v45, %v1154_v61  ;;  %v572_v5 = vmul.f32 %v564_v43, %v1150_v59  ;;  %717 = vmatprep.subr.mxu0 %v1273_v23 }
 0x228   :  { %718 = vmatpush1.msra.mxu0 %v1265_v18 }
 0x229   :  { %786 = vmatprep.subr.mxu1 %v572_v5  ;;  %v528_v60 = vpop.permute.xlu1 %527 }
 0x22a   :  { %v535_v62 = vsel %vm139_vm4, %v526_v53, %v528_v60  ;;  %v502_v13 = vpop.permute.xlu0 %501  ;;  %787 = vmatpush1.msra.mxu1 %v571_v58  ;;  %v534_v59 = vsel %vm139_vm4, %v528_v60, %v530_v57 }
 0x22b   :  { %v542_v11 = vmul.f32 %v535_v62, %v1171_v19  ;;  %788 = vmatprep.subr.mxu1 %v1279_v31  ;;  %v543_v31 = vmul.f32 %v534_v59, %v1181_v25 }
 0x22c   :  { %789 = vmatpush1.msra.mxu1 %v1267_v21 }
 0x22d   :  { %719 = vmatprep.subr.mxu0 %v542_v11  ;;  %v532_v61 = vpop.permute.xlu1 %531 }
 0x22e   :  { %v533_v18 = vsel %vm139_vm4, %v530_v57, %v532_v61  ;;  %v536_v23 = vsel %vm139_vm4, %v532_v61, %v526_v53  ;;  %v506_v6 = vpop.permute.xlu0 %505 }
 0x22f   :  { %v541_v7 = vmul.f32 %v536_v23, %v1179_v24  ;;  %v544_v19 = vmul.f32 %v533_v18, %v1183_v26 }
 0x231   :  { %720 = vmatpush1.msra.mxu0 %v541_v7  ;;  %790 = vmatprep.subr.mxu1 %v544_v19  ;;  %v504_v21 = vpop.permute.xlu1 %503 }
 0x232   :  { %v511_v9 = vsel %vm114_vm5, %v502_v13, %v504_v21  ;;  %v478_v17 = vpop.permute.xlu0 %477  ;;  %791 = vmatpush1.msra.mxu1 %v543_v31  ;;  %v510_v12 = vsel %vm114_vm5, %v504_v21, %v506_v6 }
 0x233   :  { %v518_v14 = vmul.f32 %v511_v9, %v1196_v39  ;;  %v519_v4 = vmul.f32 %v510_v12, %v1203_v49 }
 0x235   :  { %721 = vmatprep.subr.mxu0 %v518_v14  ;;  %v508_v20 = vpop.permute.xlu1 %507 }
 0x236   :  { %v509_v24 = vsel %vm114_vm5, %v506_v6, %v508_v20  ;;  %v512_v25 = vsel %vm114_vm5, %v508_v20, %v502_v13  ;;  %v482_v32 = vpop.permute.xlu0 %481 }
 0x237   :  { %v517_v26 = vmul.f32 %v512_v25, %v1201_v48  ;;  %v520_v22 = vmul.f32 %v509_v24, %v1205_v50 }
 0x239   :  { %722 = vmatpush1.msra.mxu0 %v517_v26  ;;  %792 = vmatprep.subr.mxu1 %v520_v22  ;;  %v480_v39 = vpop.permute.xlu1 %479 }
 0x23a   :  { %v487_v30 = vsel %vm89_vm6, %v478_v17, %v480_v39  ;;  %793 = vmatpush1.msra.mxu1 %v519_v4  ;;  %v486_v34 = vsel %vm89_vm6, %v480_v39, %v482_v32  ;;  %v454_v48 = vpop.permute.xlu0 %453 }
 0x23b   :  { %v494_v28 = vmul.f32 %v487_v30, %v1217_v63  ;;  %v495_v29 = vmul.f32 %v486_v34, %v1224_v15 }
 0x23d   :  { %723 = vmatprep.subr.mxu0 %v494_v28  ;;  %v484_v35 = vpop.permute.xlu1 %483 }
 0x23e   :  { %v485_v50 = vsel %vm89_vm6, %v482_v32, %v484_v35  ;;  %v488_v49 = vsel %vm89_vm6, %v484_v35, %v478_v17  ;;  %v458_v47 = vpop.permute.xlu0 %457 }
 0x23f   :  { %v493_v36 = vmul.f32 %v488_v49, %v1222_v10  ;;  %v496_v37 = vmul.f32 %v485_v50, %v1226_v16 }
 0x241   :  { %724 = vmatpush1.msra.mxu0 %v493_v36  ;;  %794 = vmatprep.subr.mxu1 %v496_v37  ;;  %v456_v63 = vpop.permute.xlu1 %455 }
 0x242   :  { %v463_v27 = vsel %vm64_vm7, %v454_v48, %v456_v63  ;;  %795 = vmatpush1.msra.mxu1 %v495_v29  ;;  %v462_v51 = vsel %vm64_vm7, %v456_v63, %v458_v47 }
 0x243   :  { %v470_v42 = vmul.f32 %v463_v27, %v1238_v33  ;;  %v649_v33 = vld [vmem:[%s1456_s4] sm:$0xff]  ;;  %v471_v44 = vmul.f32 %v462_v51, %v1245_v40  ;;  %s965_s4 = smov [#allocation8]  }
 0x244   :  { %s855_s20 = sshll.u32 %s965_s4, 4  ;;  %s856_s20 = int_to_ptr.vmem [resolvable:$true] %s855_s20 }
 0x245   :  { %725 = vmatprep.subr.mxu0 %v470_v42  ;;  %v460_v52 = vpop.permute.xlu1 %459  ;;  %s925_s21 = scalar_lea.vmem %s856_s20, 512  ;;  %p930_p11 = scmp.lt.s32.totalorder %s856_s20, %s856_s20 }
 0x246   :  { %v461_v10 = vsel %vm64_vm7, %v458_v47, %v460_v52  ;;  %v464_v15 = vsel %vm64_vm7, %v460_v52, %v454_v48  ;;  %p926_p10 = scmp.ne.s32.totalorder %s856_s20, %s925_s21  ;;  %p931_p12 = scmp.lt.s32.totalorder %s925_s21, %s925_s21 }
 0x247   :  { %v469_v16 = vmul.f32 %v464_v15, %v1243_v38  ;;  %v472_v46 = vmul.f32 %v461_v10, %v1247_v41 }
 0x248   :  { %p932_p13 = por %p931_p12, %p930_p11 }
 0x249   :  { %726 = vmatpush1.msra.mxu0 %v469_v16  ;;  %796 = vmatprep.subr.mxu1 %v472_v46 }
 0x24a   :  { %867 = vmatmul.mubr.msk.f32.vlgmr.msra.gmra.mxu0 %vm303_vm8, %v649_v33  ;;  %797 = vmatpush1.msra.mxu1 %v471_v44  ;;  %p933_p0 = pnand %p932_p13, %p926_p10 }
 0x24b   :  { %868 = vmatmul.mubr.msk.f32.vlgmr.msra.gmra.mxu1 %vm303_vm8, %v649_v33  ;;  %v690_v53 = vpop.permute.xlu0 %689 }
 0x30a   :  { %v761_v8 = vpop.f32.mrf.mxu0 }
 0x30b   :  { %v762_v54 = vadd.f32 %v761_v8, %v690_v53  ;;  %v832_v55 = vpop.f32.mrf.mxu1 }
 0x30c   :  { %v833_v38 = vadd.f32 %v832_v55, %v690_v53  ;;  %v763_v56 = vpop.f32.mrf.mxu0 }
 0x30d   :  { %v837_v41 = vadd.f32 %v762_v54, %v1009_v1  ;;  %v764_v45 = vadd.f32 %v763_v56, %v690_v53  ;;  %v834_v43 = vpop.f32.mrf.mxu1 }
 0x30e   :  { %v839_v57 = vadd.f32 %v833_v38, %v1007_v0  ;;  %v835_v40 = vadd.f32 %v834_v43, %v690_v53 }
 0x30f   :  { %v841_v58 = vmax.f32 %v837_v41, 0.0  ;;  %v838_v5 = vadd.f32 %v764_v45, %v1017_v3 }
 0x310   :  { %v843_v60 = vmax.f32 %v839_v57, 0.0  ;;  %v840_v62 = vadd.f32 %v835_v40, %v1015_v2 }
 0x311   :  { %845 = vst [vmem:[#allocation8] sm:$0xff] %v841_v58  ;;  %v842_v13 = vmax.f32 %v838_v5, 0.0 }
 0x312   :  { %847 = vst [vmem:[#allocation8 + $0x10] sm:$0xff] %v843_v60  ;;  %v844_v11 = vmax.f32 %v840_v62, 0.0 }
 0x313   :  { %846 = vst [vmem:[#allocation8 + $0x8] sm:$0xff] %v842_v13 }
 0x314   :  { %848 = vst [vmem:[#allocation8 + $0x18] sm:$0xff] %v844_v11 }
 0x315   :  { %936 = shalt.err (!%p933_p0)
}
 0x316   :  { %858 = dma.vmem_to_hbm [thread:$0]  %s856_s20, 512, %s1458_s6, [#allocation5]  }
 0x317   :  { %949 = dma.done.wait [#allocation5], 512  }
 0x318   :  { %950 = vsyncadd [#allocation5], 4294966784 }
 0x319   :  { %862 = vsyncpa [#allocation4], 1 }
 0x31a   :  { %863 = vsyncpa [#allocation7], 1 }
 0x31b   :  { %864 = vsyncpa [#allocation5], 1 }

</bundles_post_ra>
